<compile_context>
chip_gen: v7x
topology: tpu7x:2x2x1
jax: 0.10.0
libtpu: 0.0.40
codegen_flags: <defaults>
</compile_context>

<pallas_src>
import math

import jax
import jax.numpy as jnp
from jax import lax
from jax.experimental import pallas as pl
from jax.experimental.pallas import tpu as pltpu


_INV_SQRT2 = 1.0 / math.sqrt(2.0)
_TM_TARGET = 512          # default row tile (review: 512-1024 for v5e/v6e rooflines)
_MIN_VMEM = 64 * 1024 * 1024   # conservative per-TC floor (v7x)


# --------------------------------------------------------------------------- kernel


def _ffn_kernel(x_ref, w1_ref, b1_ref, w2_ref, b2_ref, o_ref, acc_ref):
    # x_ref:  (tm, d_in)        w1_ref: (tk, d_in)      b1_ref: (1, tk)
    # w2_ref: (d_out, tk)       b2_ref: (1, d_out)
    # o_ref:  (tm, d_out)       acc_ref: (tm, d_out) f32 scratch (output accumulator)
    k = pl.program_id(1)

    # ffn01 chunk: native-dtype MXU matmul against the native (d_hidden, d_in) layout,
    # contracting both operands on their last dim (== x @ W1_chunk^T), f32 accumulate.
    h = lax.dot_general(
        x_ref[...], w1_ref[...],
        dimension_numbers=(((1,), (1,)), ((), ())),
        preferred_element_type=jnp.float32,
    )
    h = h + b1_ref[...].astype(jnp.float32)

    # Exact (erf) GELU in f32 -- matches torch.nn.GELU() default (approximate='none').
    h = 0.5 * h * (1.0 + lax.erf(h * _INV_SQRT2))

    # Dropout with p=0 / eval mode is the identity.
    # TODO(synk): training-mode dropout (p>0) would need pltpu.prng_seed /
    # prng_random_bits masking; module default (p=0) and eval semantics are identity.

    # ffn02 chunk: cast activation to the weight dtype for the MXU; contract against
    # the native (d_out, d_hidden) layout on the last dims (== h @ W2_chunk^T).
    contrib = lax.dot_general(
        h.astype(w2_ref.dtype), w2_ref[...],
        dimension_numbers=(((1,), (1,)), ((), ())),
        preferred_element_type=jnp.float32,
    )

    @pl.when(k == 0)
    def _first():
        # First hidden chunk: write the accumulator directly and fold in b2 (no
        # zero-init pass, no finalize add).
        acc_ref[...] = contrib + b2_ref[...].astype(jnp.float32)

    @pl.when(k > 0)
    def _rest():
        acc_ref[...] += contrib

    @pl.when(k == pl.num_programs(1) - 1)
    def _finalize():
        o_ref[...] = acc_ref[...].astype(o_ref.dtype)


# ------------------------------------------------------------------ chip-aware sizing


def _tpu_info():
    try:
        return pltpu.get_tpu_info()
    except Exception:
        return None


def _vmem_capacity_bytes():
    info = _tpu_info()
    cap = getattr(info, "vmem_capacity_bytes", None) if info is not None else None
    if not isinstance(cap, int) or cap <= 0:
        cap = _MIN_VMEM
    return cap


def _num_tensorcores():
    info = _tpu_info()
    for name in ("num_tensorcores", "tensorcores_per_chip", "num_cores", "cores_per_chip"):
        v = getattr(info, name, None) if info is not None else None
        if isinstance(v, int) and v > 0:
            return v
    try:
        kind = jax.devices()[0].device_kind.lower()
        if "v7" in kind:
            return 2
    except Exception:
        pass
    return 1     # v5e / v6e: one TensorCore per chip


def _round_down(x, mult):
    return max(mult, (x // mult) * mult)


def _tile_bytes(tm, tk, d_in, d_out, itemsize):
    # Double-buffered x/W1/W2/out blocks + single f32 accumulator (bias blocks ~0).
    return (2 * itemsize * (tm * d_in + tk * d_in + tk * d_out + tm * d_out)
            + 4 * tm * d_out)


def _choose_tm(m, num_tc, tm_req):
    tm = _TM_TARGET if tm_req is None else tm_req
    tm = min(tm, m)
    if tm < m:
        tm = _round_down(tm, 8)
    # Only split rows into more blocks when there are multiple TensorCores to feed
    # (v7x).  On single-TC v5e/v6e extra row tiles just re-stream W1/W2 from HBM.
    if tm_req is None and num_tc > 1 and m > 8 * num_tc and pl.cdiv(m, tm) < num_tc:
        per_core = pl.cdiv(m, num_tc)
        tm = min(m, max(8, ((per_core + 7) // 8) * 8))
    return tm


def _choose_tk(tm, d_in, d_hidden, d_out, itemsize, budget):
    fixed = 2 * itemsize * tm * (d_in + d_out) + 4 * tm * d_out
    per_tk = 2 * itemsize * (d_in + d_out)
    avail = budget - fixed
    if avail <= per_tk * 128:
        return min(128, d_hidden)          # minimum lane-aligned chunk
    tk_max = avail // per_tk
    if tk_max >= d_hidden:
        return d_hidden
    tk_max = _round_down(tk_max, 128)
    # Prefer the largest 128-multiple divisor of d_hidden (no hidden-dim padding).
    for t in range(tk_max, 127, -128):
        if d_hidden % t == 0:
            return t
    return tk_max                          # no clean divisor: wrapper zero-pads.


# ------------------------------------------------------------------------- wrapper


def position_wise_ffn(x, w1, b1, w2, b2, *, tm=None, tk=None):
    """x: (..., d_in); w1: (d_hidden, d_in); b1: (d_hidden,);
    w2: (d_out, d_hidden); b2: (d_out,).  Returns (..., d_out)."""
    d_in = x.shape[-1]
    d_hidden = w1.shape[0]
    d_out = w2.shape[0]

    lead = x.shape[:-1]
    m = int(math.prod(lead)) if lead else 1
    x2d = x.reshape(m, d_in)

    itemsize = max(jnp.dtype(x.dtype).itemsize, jnp.dtype(w1.dtype).itemsize)

    # Chip-aware VMEM budget (112 MiB limit on 128 MiB v5e/v6e, 56 MiB on 64 MiB v7x).
    vmem_cap = _vmem_capacity_bytes()
    vmem_limit = (vmem_cap * 7) // 8
    tile_budget = max(8 << 20, vmem_limit - (4 << 20))
    num_tc = _num_tensorcores()

    # Row tile, then hidden chunk from the explicit byte budget; back tm off if even
    # a 128-wide hidden chunk will not fit (very large d_in/d_out on v7x).
    tm_sel = _choose_tm(m, num_tc, tm)
    if tk is not None:
        tk_sel = min(tk, d_hidden)
    else:
        tk_sel = _choose_tk(tm_sel, d_in, d_hidden, d_out, itemsize, tile_budget)
        if tm is None:
            while (_tile_bytes(tm_sel, tk_sel, d_in, d_out, itemsize) > tile_budget
                   and tm_sel > 8):
                tm_sel = _round_down(max(tm_sel // 2, 8), 8)
                tk_sel = _choose_tk(tm_sel, d_in, d_hidden, d_out, itemsize, tile_budget)

    # If tk does not divide d_hidden, zero-pad the hidden dim once (zero rows of W1 /
    # zero entries of b1 give GELU(0)=0, and zero cols of W2 contribute exactly 0).
    kt = pl.cdiv(d_hidden, tk_sel)
    d_hidden_pad = kt * tk_sel
    if d_hidden_pad != d_hidden:
        pad = d_hidden_pad - d_hidden
        w1 = jnp.pad(w1, ((0, pad), (0, 0)))
        b1 = jnp.pad(b1, ((0, pad),))
        w2 = jnp.pad(w2, ((0, 0), (0, pad)))

    b1_2d = b1.reshape(1, d_hidden_pad)
    b2_2d = b2.reshape(1, d_out)

    grid = (pl.cdiv(m, tm_sel), kt)

    cost = pl.CostEstimate(
        flops=2 * m * d_hidden * (d_in + d_out),
        transcendentals=m * d_hidden,
        bytes_accessed=(x2d.size * jnp.dtype(x.dtype).itemsize
                        + (w1.size + b1.size) * jnp.dtype(w1.dtype).itemsize
                        + (w2.size + b2.size) * jnp.dtype(w2.dtype).itemsize
                        + m * d_out * jnp.dtype(x.dtype).itemsize),
    )

    out2d = pl.pallas_call(
        _ffn_kernel,
        out_shape=jax.ShapeDtypeStruct((m, d_out), x.dtype),
        grid_spec=pltpu.PrefetchScalarGridSpec(
            num_scalar_prefetch=0,
            grid=grid,
            in_specs=[
                pl.BlockSpec((tm_sel, d_in), lambda i, k: (i, 0)),   # x rows
                pl.BlockSpec((tk_sel, d_in), lambda i, k: (k, 0)),   # W1 hidden chunk
                pl.BlockSpec((1, tk_sel), lambda i, k: (0, k)),      # b1 hidden chunk
                pl.BlockSpec((d_out, tk_sel), lambda i, k: (0, k)),  # W2 hidden chunk
                pl.BlockSpec((1, d_out), lambda i, k: (0, 0)),       # b2
            ],
            out_specs=pl.BlockSpec((tm_sel, d_out), lambda i, k: (i, 0)),
            scratch_shapes=[pltpu.VMEM((tm_sel, d_out), jnp.float32)],
        ),
        compiler_params=pltpu.CompilerParams(
            dimension_semantics=("parallel", "arbitrary"),
            vmem_limit_bytes=int(vmem_limit),
        ),
        cost_estimate=cost,
    )(x2d, w1, b1_2d, w2, b2_2d)

    return out2d.reshape(*lead, d_out)


# --------------------------------------------------------------------------- demo


if __name__ == "__main__":
    def reference(x, w1, b1, w2, b2):
        h = x @ w1.T + b1
        h = 0.5 * h * (1.0 + lax.erf(h / math.sqrt(2.0)))
        return h @ w2.T + b2

    def make_params(key, d_in, d_hidden, d_out):
        kw1, kb1, kw2, kb2 = jax.random.split(key, 4)
        lim1 = 1.0 / math.sqrt(d_in)
        w1 = jax.random.uniform(kw1, (d_hidden, d_in), jnp.float32, -lim1, lim1)
        b1 = jax.random.uniform(kb1, (d_hidden,), jnp.float32, -lim1, lim1)
        lim2 = 1.0 / math.sqrt(d_hidden)
        w2 = jax.random.uniform(kw2, (d_out, d_hidden), jnp.float32, -lim2, lim2)
        b2 = jax.random.uniform(kb2, (d_out,), jnp.float32, -lim2, lim2)
        return w1, b1, w2, b2

    key = jax.random.PRNGKey(0)
    k1, k2, k3, k4 = jax.random.split(key, 4)

    # Test 1: tiny shapes consistent with the module's forward (batch, seq, d_in).
    batch, seq, d_in, d_hidden, d_out = 2, 8, 32, 64, 32
    x = jax.random.normal(k1, (batch, seq, d_in), dtype=jnp.float32)
    w1, b1, w2, b2 = make_params(k2, d_in, d_hidden, d_out)
    out = jax.block_until_ready(position_wise_ffn(x, w1, b1, w2, b2))
    ref = reference(x, w1, b1, w2, b2)
    assert out.shape == (batch, seq, d_out)
    assert jnp.allclose(out, ref, atol=2e-4, rtol=2e-4)

    # Test 2: exercise the M-tiled grid and the chunked f32-accumulator reduction path.
    batch, seq, d_in, d_hidden, d_out = 2, 8, 32, 256, 32
    x = jax.random.normal(k3, (batch, seq, d_in), dtype=jnp.float32)
    w1, b1, w2, b2 = make_params(k4, d_in, d_hidden, d_out)
    out = jax.block_until_ready(position_wise_ffn(x, w1, b1, w2, b2, tm=8, tk=128))
    ref = reference(x, w1, b1, w2, b2)
    assert out.shape == (batch, seq, d_out)
    assert jnp.allclose(out, ref, atol=2e-4, rtol=2e-4)

    print("KERNEL_OK")
</pallas_src>

<mosaic_0001>
module attributes {stable_mosaic.version = 11 : i64} {
  func.func @_ffn_kernel(%arg0: i32, %arg1: i32, %arg2: memref<16x32xf32, #tpu.memory_space<vmem>>, %arg3: memref<64x32xf32, #tpu.memory_space<vmem>>, %arg4: memref<1x64xf32, #tpu.memory_space<vmem>>, %arg5: memref<32x64xf32, #tpu.memory_space<vmem>>, %arg6: memref<1x32xf32, #tpu.memory_space<vmem>>, %arg7: memref<16x32xf32, #tpu.memory_space<vmem>>, %arg8: memref<16x32xf32, #tpu.memory_space<vmem>>) attributes {dimension_semantics = [#tpu.dimension_semantics<parallel>, #tpu.dimension_semantics<arbitrary>], iteration_bounds = array<i64: 1, 1>, scalar_prefetch = 0 : i64, scratch_operands = 1 : i64, tpu.core_type = #tpu.core_type<tc>, window_params = [{transform_indices = @transform_0, window_bounds = array<i64: 16, 32>}, {transform_indices = @transform_1, window_bounds = array<i64: 64, 32>}, {transform_indices = @transform_2, window_bounds = array<i64: 1, 64>}, {transform_indices = @transform_3, window_bounds = array<i64: 32, 64>}, {pipeline_mode = #tpu.pipeline_mode<synchronous>, transform_indices = @transform_4, window_bounds = array<i64: 1, 32>}, {transform_indices = @transform_5, window_bounds = array<i64: 16, 32>}]} {
    %c0 = arith.constant 0 : index
    %c0_0 = arith.constant 0 : index
    %0 = vector.load %arg2[%c0, %c0_0] : memref<16x32xf32, #tpu.memory_space<vmem>>, vector<16x32xf32>
    %c0_1 = arith.constant 0 : index
    %c0_2 = arith.constant 0 : index
    %1 = vector.load %arg3[%c0_1, %c0_2] : memref<64x32xf32, #tpu.memory_space<vmem>>, vector<64x32xf32>
    %cst = arith.constant dense<0.000000e+00> : vector<16x64xf32>
    %2 = tpu.matmul %0, %1, %cst {dimension_numbers = #tpu.dot_dimension_numbers<[1], [1], [0], [0], [0, 0, 1, 0], [], []>} : vector<16x32xf32>, vector<64x32xf32>, vector<16x64xf32> -> vector<16x64xf32>
    %c0_3 = arith.constant 0 : index
    %c0_4 = arith.constant 0 : index
    %3 = vector.load %arg4[%c0_3, %c0_4] : memref<1x64xf32, #tpu.memory_space<vmem>>, vector<1x64xf32>
    %4 = vector.broadcast %3 : vector<1x64xf32> to vector<16x64xf32>
    %5 = arith.addf %2, %4 : vector<16x64xf32>
    %cst_5 = arith.constant 5.000000e-01 : f32
    %6 = vector.broadcast %cst_5 : f32 to vector<16x64xf32>
    %7 = arith.mulf %6, %5 : vector<16x64xf32>
    %cst_6 = arith.constant 0.707106769 : f32
    %8 = vector.broadcast %cst_6 : f32 to vector<16x64xf32>
    %9 = arith.mulf %5, %8 : vector<16x64xf32>
    %10 = math.erf %9 : vector<16x64xf32>
    %cst_7 = arith.constant 1.000000e+00 : f32
    %11 = vector.broadcast %cst_7 : f32 to vector<16x64xf32>
    %12 = arith.addf %11, %10 : vector<16x64xf32>
    %13 = arith.mulf %7, %12 : vector<16x64xf32>
    %c0_8 = arith.constant 0 : index
    %c0_9 = arith.constant 0 : index
    %14 = vector.load %arg5[%c0_8, %c0_9] : memref<32x64xf32, #tpu.memory_space<vmem>>, vector<32x64xf32>
    %cst_10 = arith.constant dense<0.000000e+00> : vector<16x32xf32>
    %15 = tpu.matmul %13, %14, %cst_10 {dimension_numbers = #tpu.dot_dimension_numbers<[1], [1], [0], [0], [0, 0, 1, 0], [], []>} : vector<16x64xf32>, vector<32x64xf32>, vector<16x32xf32> -> vector<16x32xf32>
    %c0_i32 = arith.constant 0 : i32
    %16 = arith.cmpi eq, %arg1, %c0_i32 : i32
    %17 = arith.extui %16 : i1 to i32
    %c0_i32_11 = arith.constant 0 : i32
    %18 = arith.cmpi ne, %17, %c0_i32_11 : i32
    scf.if %18 {
      %c0_16 = arith.constant 0 : index
      %c0_17 = arith.constant 0 : index
      %25 = vector.load %arg6[%c0_16, %c0_17] : memref<1x32xf32, #tpu.memory_space<vmem>>, vector<1x32xf32>
      %26 = vector.broadcast %25 : vector<1x32xf32> to vector<16x32xf32>
      %27 = arith.addf %15, %26 : vector<16x32xf32>
      %c0_18 = arith.constant 0 : index
      %c0_19 = arith.constant 0 : index
      %28 = vector.load %arg8[%c0_18, %c0_19] : memref<16x32xf32, #tpu.memory_space<vmem>>, vector<16x32xf32>
      tpu.vector_store %arg8[%c0_18, %c0_19], %27 {strides = array<i32>} : memref<16x32xf32, #tpu.memory_space<vmem>>, vector<16x32xf32>,
    } else {
    }
    %c0_i32_12 = arith.constant 0 : i32
    %19 = arith.cmpi sgt, %arg1, %c0_i32_12 : i32
    %20 = arith.extui %19 : i1 to i32
    %c0_i32_13 = arith.constant 0 : i32
    %21 = arith.cmpi ne, %20, %c0_i32_13 : i32
    scf.if %21 {
      %c0_16 = arith.constant 0 : index
      %c0_17 = arith.constant 0 : index
      %25 = vector.load %arg8[%c0_16, %c0_17] : memref<16x32xf32, #tpu.memory_space<vmem>>, vector<16x32xf32>
      %26 = arith.addf %25, %15 : vector<16x32xf32>
      %c0_18 = arith.constant 0 : index
      %c0_19 = arith.constant 0 : index
      %27 = vector.load %arg8[%c0_18, %c0_19] : memref<16x32xf32, #tpu.memory_space<vmem>>, vector<16x32xf32>
      tpu.vector_store %arg8[%c0_18, %c0_19], %26 {strides = array<i32>} : memref<16x32xf32, #tpu.memory_space<vmem>>, vector<16x32xf32>,
    } else {
    }
    %c0_i32_14 = arith.constant 0 : i32
    %22 = arith.cmpi eq, %arg1, %c0_i32_14 : i32
    %23 = arith.extui %22 : i1 to i32
    %c0_i32_15 = arith.constant 0 : i32
    %24 = arith.cmpi ne, %23, %c0_i32_15 : i32
    scf.if %24 {
      %c0_16 = arith.constant 0 : index
      %c0_17 = arith.constant 0 : index
      %25 = vector.load %arg8[%c0_16, %c0_17] : memref<16x32xf32, #tpu.memory_space<vmem>>, vector<16x32xf32>
      %c0_18 = arith.constant 0 : index
      %c0_19 = arith.constant 0 : index
      %26 = vector.load %arg7[%c0_18, %c0_19] : memref<16x32xf32, #tpu.memory_space<vmem>>, vector<16x32xf32>
      tpu.vector_store %arg7[%c0_18, %c0_19], %25 {strides = array<i32>} : memref<16x32xf32, #tpu.memory_space<vmem>>, vector<16x32xf32>,
    } else {
    }
    return
  }
  func.func @transform_0(%arg0: i32, %arg1: i32) -> (i32, i32) {
    %c0_i32 = arith.constant 0 : i32
    %c0_i32_0 = arith.constant 0 : i32
    return %arg0, %c0_i32 : i32, i32
  }
  func.func @transform_1(%arg0: i32, %arg1: i32) -> (i32, i32) {
    %c0_i32 = arith.constant 0 : i32
    %c0_i32_0 = arith.constant 0 : i32
    return %arg1, %c0_i32 : i32, i32
  }
  func.func @transform_2(%arg0: i32, %arg1: i32) -> (i32, i32) {
    %c0_i32 = arith.constant 0 : i32
    %c0_i32_0 = arith.constant 0 : i32
    return %c0_i32, %arg1 : i32, i32
  }
  func.func @transform_3(%arg0: i32, %arg1: i32) -> (i32, i32) {
    %c0_i32 = arith.constant 0 : i32
    %c0_i32_0 = arith.constant 0 : i32
    return %c0_i32, %arg1 : i32, i32
  }
  func.func @transform_4(%arg0: i32, %arg1: i32) -> (i32, i32) {
    %c0_i32 = arith.constant 0 : i32
    %c0_i32_0 = arith.constant 0 : i32
    %c0_i32_1 = arith.constant 0 : i32
    return %c0_i32, %c0_i32_0 : i32, i32
  }
  func.func @transform_5(%arg0: i32, %arg1: i32) -> (i32, i32) {
    %c0_i32 = arith.constant 0 : i32
    %c0_i32_0 = arith.constant 0 : i32
    return %arg0, %c0_i32 : i32, i32
  }
}

</mosaic_0001>

<bundles_post_ra>
// kernel: tpu_custom_call.1
= control target key start
LH: loop header
LB: loop body
LE: loop exit
PB: predicated region body
PF: predicated region fallthrough
CT: control target
= control target key end

     0   :  { %vm38_vm0 = vcmask 261120   ;;  %s556_s0 = inlined_call_operand.vmem [shape: f32[16,32], index: 0, kind: input, shape index: {}]   ;;  %s557_s1 = inlined_call_operand.vmem [shape: f32[64,32], index: 1, kind: input, shape index: {}]   ;;  %s558_s2 = inlined_call_operand.vmem [shape: f32[1,64], index: 2, kind: input, shape index: {}]   ;;  %s559_s3 = inlined_call_operand.vmem [shape: f32[32,64], index: 3, kind: input, shape index: {}]   ;;  %s560_s4 = inlined_call_operand.vmem [shape: f32[1,32], index: 4, kind: input, shape index: {}]   ;;  %s561_s5 = inlined_call_operand.hbm [shape: f32[16,32], index: 5, kind: output, shape index: {}]  }
   0x1   :  { %v23_v0 = vld [vmem:[%s557_s1] sm:$0xff]  ;;  %v24_v1 = vld [vmem:[%s557_s1 + $0x8] sm:$0xff]  ;;  %v25_v2 = vld [vmem:[%s557_s1 + $0x10] sm:$0xff] }
   0x2   :  { %v364_v3 = vpack.c.bf16 %v24_v1, %v23_v0  ;;  %vm475_vm1 = vmpackc.low %vm38_vm0, %vm38_vm0  ;;  %v26_v5 = vld [vmem:[%s557_s1 + $0x18] sm:$0xff]  ;;  %v21_v7 = vld [vmem:[%s556_s0] sm:$0xff] }
   0x3   :  { %v370_v6 = vpack.c.bf16 %v26_v5, %v25_v2 }
   0x4   :  { %366 = vmatprep.subr.msk.bf16.mxu0 %vm475_vm1, %v364_v3 }
   0x5   :  { %10 = vsyncpa [#allocation4], 0  ;;  %369 = vmatpush3.bf16.xpose.msk.msra.mxu0 %vm475_vm1, %v364_v3  ;;  %350 = vmatprep.mubr.msk.f32.mxu0 %vm38_vm0, %v21_v7  ;;  %v27_v8 = vld [vmem:[%s557_s1 + $0x20] sm:$0xff]  ;;  %v28_v9 = vld [vmem:[%s557_s1 + $0x28] sm:$0xff]  ;;  %vm158_vm2 = vcmask 523264   ;;  %s431_s21 = smov [#allocation3]  }
   0x6   :  { %372 = vmatprep.subr.msk.bf16.mxu0 %vm475_vm1, %v370_v6  ;;  %v376_v10 = vpack.c.bf16 %v28_v9, %v27_v8  ;;  %v29_v11 = vld [vmem:[%s557_s1 + $0x30] sm:$0xff]  ;;  %v30_v12 = vld [vmem:[%s557_s1 + $0x38] sm:$0xff]  ;;  %v22_v14 = vld [vmem:[%s556_s0 + $0x8] sm:$0xff]  ;;  %s289_s22 = sshll.u32 %s431_s21, 4  ;;  %s290_s22 = int_to_ptr.vmem [resolvable:$true] %s289_s22 }
   0x7   :  { %v382_v13 = vpack.c.bf16 %v30_v12, %v29_v11  ;;  %v154_v15 = vld [vmem:[%s559_s3] sm:$0xff]  ;;  %v155_v16 = vld [vmem:[%s559_s3 + $0x8] sm:$0xff]  ;;  %vm389_vm3 = vmpackc.low %vm158_vm2, %vm158_vm2  ;;  %s407_s23 = scalar_lea.vmem %s290_s22, 256  ;;  %p412_p1 = scmp.lt.s32.totalorder %s290_s22, %s290_s22 }
   0x8   :  { %v388_v17 = vpack.c.bf16 %v155_v16, %v154_v15  ;;  %v156_v18 = vld [vmem:[%s559_s3 + $0x10] sm:$0xff]  ;;  %v157_v19 = vld [vmem:[%s559_s3 + $0x18] sm:$0xff]  ;;  %v300_v21 = vld [vmem:[%s558_s2] ss:$0 sm:$0xff]  ;;  %p408_p0 = scmp.ne.s32.totalorder %s290_s22, %s407_s23  ;;  %p413_p2 = scmp.lt.s32.totalorder %s407_s23, %s407_s23 }
   0x9   :  { %v394_v20 = vpack.c.bf16 %v157_v19, %v156_v18  ;;  %v317_v36 = vld [vmem:[%s560_s4] ss:$0 sm:$0xff] }
   0xa   :  { %390 = vmatprep.subr.msk.bf16.mxu1 %vm389_vm3, %v388_v17  ;;  %p414_p3 = por %p413_p2, %p412_p1 }
   0xb   :  { %393 = vmatpush3.bf16.xpose.msk.msra.mxu1 %vm389_vm3, %v388_v17 }
   0xc   :  { %396 = vmatprep.subr.msk.bf16.mxu1 %vm389_vm3, %v394_v20  ;;  %p415_p4 = pnand %p414_p3, %p408_p0 }
   0xd   :  { %375 = vmatpush3.bf16.xpose.msk.msra.mxu0 %vm475_vm1, %v370_v6 }
   0xe   :  { %378 = vmatprep.subr.msk.bf16.mxu0 %vm475_vm1, %v376_v10 }
  0x13   :  { %399 = vmatpush3.bf16.xpose.msk.msra.mxu1 %vm389_vm3, %v394_v20 }
  0x15   :  { %381 = vmatpush3.bf16.xpose.msk.msra.mxu0 %vm475_vm1, %v376_v10 }
  0x16   :  { %384 = vmatprep.subr.msk.bf16.mxu0 %vm475_vm1, %v382_v13 }
  0x1d   :  { %387 = vmatpush3.bf16.xpose.msk.msra.mxu0 %vm475_vm1, %v382_v13 }
  0x24   :  { %351 = vmatmul.mubr.msk.f32.vlgmr.msra.gmra.mrb[0].mxu0 %vm38_vm0, %v22_v14 }
  0xf7   :  { %v352_v22 = vpop.f32.mrb[0].mxu0 }
  0xf8   :  { %v141_v23 = vadd.f32 %v352_v22, %v300_v21  ;;  %v135_v24 = vpop.f32.mrb[1].mxu0 }
  0xf9   :  { %v136_v25 = vadd.f32 %v300_v21, %v135_v24 }
  0xfa   :  { %v147_v26 = vmul.f32 0.70710677, %v141_v23  ;;  %v145_v33 = vmul.f32 0.5, %v141_v23 }
  0xfb   :  { %v146_v27 = vmul.f32 0.70710677, %v136_v25  ;;  %v144_v31 = vmul.f32 0.5, %v136_v25 }
  0xfc   :  { %403 = verf.f32 %v147_v26 }
  0xfd   :  { %405 = verf.f32 %v146_v27 }
 0x106   :  { %v404_v28 = vpop.eup %403 }
 0x107   :  { %v406_v29 = vpop.eup %405  ;;  %v151_v30 = vadd.f32 1.0, %v404_v28 }
 0x108   :  { %v150_v32 = vadd.f32 1.0, %v406_v29 }
 0x109   :  { %v153_v35 = vmul.f32 %v151_v30, %v145_v33 }
 0x10a   :  { %v152_v34 = vmul.f32 %v150_v32, %v144_v31 }
 0x10c   :  { %361 = vmatprep.mubr.msk.f32.mxu1 %vm158_vm2, %v152_v34 }
 0x10d   :  { %362 = vmatmul.mubr.msk.f32.vlgmr.msra.gmra.mrb[0].mxu1 %vm158_vm2, %v153_v35 }
 0x1e0   :  { %v363_v37 = vpop.f32.mrb[0].mxu1 }
 0x1e1   :  { %v264_v38 = vadd.f32 %v363_v37, %v317_v36  ;;  %v243_v39 = vpop.f32.mrb[1].mxu1 }
 0x1e2   :  { %v263_v40 = vadd.f32 %v317_v36, %v243_v39 }
 0x1e3   :  { %266 = vst.msk [vmem:[#allocation2 + $0x8] sm:$0xff] %vm38_vm0, %v264_v38 }
 0x1e4   :  { %265 = vst.msk [vmem:[#allocation2] sm:$0xff] %vm38_vm0, %v263_v40 }
 0x1ea   :  { %v281_v41 = vld [vmem:[#allocation2 + $0x8] sm:$0xff] }
 0x1eb   :  { %v280_v42 = vld [vmem:[#allocation2] sm:$0xff]  ;;  %283 = vst.msk [vmem:[#allocation3 + $0x8] sm:$0xff] %vm38_vm0, %v281_v41 }
 0x1ec   :  { %282 = vst.msk [vmem:[#allocation3] sm:$0xff] %vm38_vm0, %v280_v42 }
 0x1ed   :  { %418 = shalt.err (!%p415_p4)
}
 0x1ee   :  { %s419_s25 = scalar_lea.hbm %s561_s5, 256 }
 0x1ef   :  { %p420_p5 = scmp.ne.s32.totalorder %s561_s5, %s419_s25  ;;  %p423_p6 = scmp.lt.u32.totalorder %s419_s25, %s561_s5 }
 0x1f1   :  { %p425_p7 = pnand %p423_p6, %p420_p5 }
 0x1f3   :  { %428 = shalt.err (!%p425_p7)
}
 0x1f4   :  { %s432_s30 = smov 128   ;;  %s433_s6 = smov 8  }
 0x1f5   :  { %295 = dma.vmem_to_hbm [thread:$0]  %s290_s22, 256, %s561_s5, [#allocation4], %s432_s30, %s432_s30, %s433_s6  }
 0x1f6   :  { %429 = dma.done.wait [#allocation4], 256  }
 0x1f7   :  { %430 = vsyncadd [#allocation4], 4294967040 }
 0x1f8   :  { %299 = vsyncpa [#allocation4], 1 }

</bundles_post_ra>
